<compile_context>
chip_gen: v6e
topology: v6e:2x2x1
jax: 0.10.0
libtpu: 0.0.40
codegen_flags: <defaults>
</compile_context>

<pallas_src>
import functools

import jax
import jax.numpy as jnp
from jax.experimental import pallas as pl
from jax.experimental.pallas import tpu as pltpu


def _round_up(x, m):
    return ((x + m - 1) // m) * m


def _vmem_capacity_bytes():
    """Physical per-core VMEM; conservative fallback (v7x = 64 MiB) on failure."""
    try:
        return int(pltpu.get_tpu_info().vmem_capacity_bytes)
    except Exception:
        return 64 << 20


# ----------------------------- shared layer math -----------------------------


def _hidden_layer(x, w, bgb, b_real):
    """Linear -> Dropout(identity) -> LeakyReLU(0.01) -> BatchNorm1d(batch stats).

    x:   (Bp, K) f32 activations (padded rows are zero / masked out of stats)
    w:   (K, Dh) f32 or bf16 (bf16 operands -> f32 MXU accumulate)
    bgb: (3, Dh) f32 rows = (bias, gamma, beta)
    """
    if w.dtype != jnp.float32:
        x = x.astype(w.dtype)
    y = jnp.dot(x, w, preferred_element_type=jnp.float32) + bgb[0:1, :]
    y = jnp.where(y >= 0.0, y, 0.01 * y)              # LeakyReLU(0.01)

    bp = y.shape[0]
    inv_n = 1.0 / float(b_real)
    # Shifted one-pass batch statistics: shifting by the first (real) row
    # removes the catastrophic-cancellation risk of raw E[y^2] - E[y]^2.
    c = y[0:1, :]
    yc = y - c
    if bp != b_real:
        rows = jax.lax.broadcasted_iota(jnp.int32, (bp, 1), 0)
        yc = jnp.where(rows < b_real, yc, 0.0)
    s1 = jnp.sum(yc, axis=0, keepdims=True)
    s2 = jnp.sum(yc * yc, axis=0, keepdims=True)
    mean_c = s1 * inv_n
    var = jnp.maximum(s2 * inv_n - mean_c * mean_c, 0.0)
    mean = mean_c + c
    # BN affine folded into one per-feature scale/shift (2 big VPU passes).
    scale = bgb[1:2, :] * jax.lax.rsqrt(var + 1e-5)
    shift = bgb[2:3, :] - mean * scale
    return y * scale + shift


def _final_linear(h, wf, bf, out_dtype):
    if wf.dtype != jnp.float32:
        h = h.astype(wf.dtype)
    return (jnp.dot(h, wf, preferred_element_type=jnp.float32) + bf).astype(out_dtype)


# ------------------------------ kernel bodies --------------------------------


def _fc_resident_kernel(x_ref, w0_ref, wr_ref, bgb_ref, wf_ref, bf_ref, out_ref,
                        *, n_hidden, b_real):
    # Small-network path: one grid step, every weight resident in VMEM, layer
    # loop unrolled at trace time (n_hidden is small on this path).
    h = _hidden_layer(x_ref[...], w0_ref[...], bgb_ref[0], b_real)
    for i in range(n_hidden - 1):
        h = _hidden_layer(h, wr_ref[i], bgb_ref[i + 1], b_real)
    out_ref[...] = _final_linear(h, wf_ref[...], bf_ref[...], out_ref.dtype)


def _fc_streamed_kernel(x_hbm, w0_hbm, wr_ref, bgb_ref, wf_ref, bf_ref,
                        out_ref, h_ref, *, n_hidden, b_real, b_p, d_in_p,
                        d_hid, w_dtype):
    # grid = (n_hidden,): per-layer (d_FC, d_FC) weights stream through the
    # BlockSpec pipeline; the activation lives in a persistent VMEM scratch.
    l = pl.program_id(0)
    bgb = bgb_ref[0]                          # (3, d_hid) this layer's b/gamma/beta

    @pl.when(l == 0)
    def _():
        # x and W0 live in HBM; one-shot DMA them into scoped VMEM (released
        # after layer 0) instead of keeping resident auto-pipelined blocks.
        def first_layer(x_vmem, w0_vmem):
            pltpu.sync_copy(x_hbm, x_vmem)
            pltpu.sync_copy(w0_hbm, w0_vmem)
            h_ref[...] = _hidden_layer(x_vmem[...], w0_vmem[...], bgb, b_real)

        pl.run_scoped(first_layer,
                      pltpu.VMEM((b_p, d_in_p), jnp.float32),
                      pltpu.VMEM((d_in_p, d_hid), w_dtype))

    @pl.when(l > 0)
    def _():
        h_ref[...] = _hidden_layer(h_ref[...], wr_ref[0], bgb, b_real)

    @pl.when(l == n_hidden - 1)
    def _():
        out_ref[...] = _final_linear(h_ref[...], wf_ref[...], bf_ref[...],
                                     out_ref.dtype)


# --------------------------------- wrapper -----------------------------------


def fc_forward(params, h, *, weight_dtype=jnp.float32, force_streamed=False):
    """Fused FC forward.  h: (B, d_graph_layer) f32 -> (B, n_tasks) f32.

    weight_dtype=jnp.bfloat16 streams half-width weight matrices from HBM
    (the win in the weight-DMA-bound regime); accumulation and all
    elementwise math stay f32.
    """
    weight_dtype = jnp.dtype(weight_dtype)
    hidden = params["hidden"]                    # [(w, b, gamma, beta), ...]
    w_final, b_final = params["final"]

    B, d_in = h.shape
    L = len(hidden)
    d_fc = hidden[0][0].shape[1]
    n_tasks = w_final.shape[1]

    f32 = jnp.float32
    Bp = _round_up(max(B, 8), 8)                 # sublane multiple
    Din = _round_up(d_in, 128)                   # lane multiples (MXU-friendly)
    Dh = _round_up(d_fc, 128)
    Np = _round_up(n_tasks, 128)                 # lane-dense output slab
    wbytes = weight_dtype.itemsize

    # Zero padding => padded rows/cols contribute nothing; gamma/beta padding
    # of 0 keeps padded activation columns exactly 0 through the stack.
    x_p = jnp.zeros((Bp, Din), f32).at[:B, :d_in].set(h.astype(f32))

    w0 = hidden[0][0]
    w0_p = jnp.zeros((Din, Dh), weight_dtype)
    w0_p = w0_p.at[:w0.shape[0], :w0.shape[1]].set(w0.astype(weight_dtype))

    n_rest = max(L - 1, 1)
    wr_p = jnp.zeros((n_rest, Dh, Dh), weight_dtype)
    for i, (w, _, _, _) in enumerate(hidden[1:]):
        wr_p = wr_p.at[i, :w.shape[0], :w.shape[1]].set(w.astype(weight_dtype))

    bgb_p = jnp.zeros((L, 3, Dh), f32)
    for i, (_, b, g, be) in enumerate(hidden):
        bgb_p = bgb_p.at[i, 0, :b.shape[1]].set(b[0])
        bgb_p = bgb_p.at[i, 1, :g.shape[1]].set(g[0])
        bgb_p = bgb_p.at[i, 2, :be.shape[1]].set(be[0])

    wf_p = jnp.zeros((Dh, Np), weight_dtype)
    wf_p = wf_p.at[:w_final.shape[0], :n_tasks].set(w_final.astype(weight_dtype))
    bf_p = jnp.zeros((1, Np), f32).at[:, :n_tasks].set(b_final)

    vmem_cap = _vmem_capacity_bytes()

    # ------------------------- resident (small) path -------------------------
    resident_bytes = (
        4 * (Bp * Din + L * 3 * Dh + Np + Bp * Np + Bp * Dh)
        + wbytes * (Din * Dh + n_rest * Dh * Dh + Dh * Np))
    use_resident = ((not force_streamed) and L <= 8
                    and 2 * resident_bytes + (2 << 20) < int(0.45 * vmem_cap))

    if use_resident:
        kernel = functools.partial(_fc_resident_kernel, n_hidden=L, b_real=B)
        vmem_limit = min(max(2 * resident_bytes + (2 << 20), 16 << 20),
                         int(0.9 * vmem_cap))
        out_p = pl.pallas_call(
            kernel,
            out_shape=jax.ShapeDtypeStruct((Bp, Np), f32),
            compiler_params=pltpu.CompilerParams(
                vmem_limit_bytes=int(vmem_limit)),
        )(x_p, w0_p, wr_p, bgb_p, wf_p, bf_p)
        return out_p[:B, :n_tasks]

    # ------------------------- streamed (large) path -------------------------
    kernel = functools.partial(
        _fc_streamed_kernel, n_hidden=L, b_real=B, b_p=Bp, d_in_p=Din,
        d_hid=Dh, w_dtype=weight_dtype)

    streamed_bytes = (
        Bp * Dh * 4                              # activation scratch
        + Bp * Din * 4 + Din * Dh * wbytes       # scoped first-layer buffers
        + 2 * Dh * Dh * wbytes                   # double-buffered W_rest block
        + 2 * 3 * Dh * 4                         # double-buffered b/gamma/beta
        + 2 * Dh * Np * wbytes + 2 * Np * 4      # final weight / bias
        + 2 * Bp * Np * 4)                       # output
    vmem_limit = min(2 * streamed_bytes + (4 << 20), int(0.9 * vmem_cap))

    out_p = pl.pallas_call(
        kernel,
        out_shape=jax.ShapeDtypeStruct((Bp, Np), f32),
        grid_spec=pltpu.PrefetchScalarGridSpec(
            num_scalar_prefetch=0,
            grid=(L,),
            in_specs=[
                pl.BlockSpec(memory_space=pl.ANY),                      # x (HBM)
                pl.BlockSpec(memory_space=pl.ANY),                      # W0 (HBM)
                pl.BlockSpec((1, Dh, Dh),
                             lambda l: (jnp.maximum(l - 1, 0), 0, 0)),  # W_l, l>=1
                pl.BlockSpec((1, 3, Dh), lambda l: (l, 0, 0)),          # b/g/beta_l
                pl.BlockSpec((Dh, Np), lambda l: (0, 0)),               # W_final
                pl.BlockSpec((1, Np), lambda l: (0, 0)),                # b_final
            ],
            out_specs=pl.BlockSpec((Bp, Np), lambda l: (0, 0)),
            scratch_shapes=[pltpu.VMEM((Bp, Dh), f32)],                 # activation
        ),
        compiler_params=pltpu.CompilerParams(
            dimension_semantics=("arbitrary",),      # layers are sequential
            vmem_limit_bytes=int(vmem_limit),
        ),
    )(x_p, w0_p, wr_p, bgb_p, wf_p, bf_p)

    return out_p[:B, :n_tasks]


# --------------------------- parameter construction --------------------------


def _init_linear(key, d_in, d_out):
    """PyTorch nn.Linear default init: U(-1/sqrt(d_in), 1/sqrt(d_in))."""
    kw, kb = jax.random.split(key)
    bound = 1.0 / jnp.sqrt(jnp.float32(d_in))
    w = jax.random.uniform(kw, (d_in, d_out), jnp.float32, -bound, bound)
    b = jax.random.uniform(kb, (1, d_out), jnp.float32, -bound, bound)
    return w, b


def init_fc_params(key, d_graph_layer, d_FC_layer, n_FC_layer, n_tasks):
    """Mirror the nn.ModuleList construction order EXACTLY.

    The original module uses non-exclusive branching (`if j == 0:` followed by
    `if j == n_FC_layer - 1: ... else: ...`), so for j == 0 with n_FC_layer > 1
    it appends BOTH the d_graph->d_FC block AND a d_FC->d_FC block.  Reproduced
    verbatim (it is the module's own structure, not a port bug).
    """
    hidden = []   # list of (w, b, gamma, beta): Linear+Dropout+LeakyReLU+BN blocks
    final = None
    for j in range(n_FC_layer):
        if j == 0:
            key, sub = jax.random.split(key)
            w, b = _init_linear(sub, d_graph_layer, d_FC_layer)
            hidden.append((w, b, jnp.ones((1, d_FC_layer), jnp.float32),
                           jnp.zeros((1, d_FC_layer), jnp.float32)))
        if j == n_FC_layer - 1:
            key, sub = jax.random.split(key)
            final = _init_linear(sub, d_FC_layer, n_tasks)
        else:
            key, sub = jax.random.split(key)
            w, b = _init_linear(sub, d_FC_layer, d_FC_layer)
            hidden.append((w, b, jnp.ones((1, d_FC_layer), jnp.float32),
                           jnp.zeros((1, d_FC_layer), jnp.float32)))
    return {"hidden": hidden, "final": final}


# ------------------------------- JAX reference -------------------------------


def fc_forward_ref(params, h):
    for (w, b, gamma, beta) in params["hidden"]:
        y = h @ w + b
        y = jnp.where(y >= 0.0, y, 0.01 * y)
        mean = jnp.mean(y, axis=0, keepdims=True)
        var = jnp.mean((y - mean) ** 2, axis=0, keepdims=True)
        h = gamma * (y - mean) * jax.lax.rsqrt(var + 1e-5) + beta
    w, b = params["final"]
    return h @ w + b


# ----------------------------------- main -------------------------------------


if __name__ == "__main__":
    B = 8
    d_graph_layer = 32
    d_FC_layer = 32
    n_FC_layer = 3
    dropout = 0.2   # identity at inference
    n_tasks = 1

    key = jax.random.PRNGKey(0)
    key, k_h, k_p = jax.random.split(key, 3)
    h = jax.random.normal(k_h, (B, d_graph_layer), jnp.float32)
    params = init_fc_params(k_p, d_graph_layer, d_FC_layer, n_FC_layer, n_tasks)
    ref = fc_forward_ref(params, h)

    # 1) f32, resident (single-step) path: faithful to the f32 PyTorch forward.
    out_res = jax.block_until_ready(fc_forward(params, h))
    assert out_res.shape == (B, n_tasks), out_res.shape
    assert jnp.allclose(out_res, ref, atol=2e-4, rtol=2e-4), (
        "resident f32 mismatch: " + str(jnp.max(jnp.abs(out_res - ref))))

    # 2) f32, streamed (layer-grid) path: same math, pipelined weight streaming.
    out_str = jax.block_until_ready(fc_forward(params, h, force_streamed=True))
    assert out_str.shape == (B, n_tasks), out_str.shape
    assert jnp.allclose(out_str, ref, atol=2e-4, rtol=2e-4), (
        "streamed f32 mismatch: " + str(jnp.max(jnp.abs(out_str - ref))))

    # 3) bf16-weight streamed path: half-width weight DMAs, f32 accumulate.
    #    Documented/verified tolerance vs the f32 reference (not just finiteness).
    out_bf16 = jax.block_until_ready(
        fc_forward(params, h, weight_dtype=jnp.bfloat16, force_streamed=True))
    assert out_bf16.shape == (B, n_tasks), out_bf16.shape
    assert bool(jnp.all(jnp.isfinite(out_bf16)))
    assert jnp.allclose(out_bf16, ref, atol=1e-1, rtol=1e-1), (
        "bf16 weights outside expected tolerance: "
        + str(jnp.max(jnp.abs(out_bf16 - ref))))

    print("KERNEL_OK")
</pallas_src>

<mosaic_0001>
module attributes {stable_mosaic.version = 11 : i64} {
  func.func @_fc_resident_kernel(%arg0: memref<8x128xf32, #tpu.memory_space<vmem>>, %arg1: memref<128x128xf32, #tpu.memory_space<vmem>>, %arg2: memref<2x128x128xf32, #tpu.memory_space<vmem>>, %arg3: memref<3x3x128xf32, #tpu.memory_space<vmem>>, %arg4: memref<128x128xf32, #tpu.memory_space<vmem>>, %arg5: memref<1x128xf32, #tpu.memory_space<vmem>>, %arg6: memref<8x128xf32, #tpu.memory_space<vmem>>) attributes {dimension_semantics = [], scalar_prefetch = 0 : i64, scratch_operands = 0 : i64, tpu.core_type = #tpu.core_type<tc>} {
    %c0 = arith.constant 0 : index
    %c0_0 = arith.constant 0 : index
    %0 = vector.load %arg0[%c0, %c0_0] : memref<8x128xf32, #tpu.memory_space<vmem>>, vector<8x128xf32>
    %c0_1 = arith.constant 0 : index
    %c0_2 = arith.constant 0 : index
    %1 = vector.load %arg1[%c0_1, %c0_2] : memref<128x128xf32, #tpu.memory_space<vmem>>, vector<128x128xf32>
    %c0_3 = arith.constant 0 : index
    %c0_4 = arith.constant 0 : index
    %c0_5 = arith.constant 0 : index
    %2 = vector.load %arg3[%c0_3, %c0_4, %c0_5] : memref<3x3x128xf32, #tpu.memory_space<vmem>>, vector<1x3x128xf32>
    %3 = vector.shape_cast %2 : vector<1x3x128xf32> to vector<3x128xf32>
    %cst = arith.constant dense<0.000000e+00> : vector<8x128xf32>
    %4 = tpu.matmul %0, %1, %cst {dimension_numbers = #tpu.dot_dimension_numbers<[1], [0], [0], [1], [0, 0, 1, 1], [], []>} : vector<8x128xf32>, vector<128x128xf32>, vector<8x128xf32> -> vector<8x128xf32>
    %5 = vector.extract_strided_slice %3 {offsets = [0, 0], sizes = [1, 128], strides = [1, 1]} : vector<3x128xf32> to vector<1x128xf32>
    %6 = vector.broadcast %5 : vector<1x128xf32> to vector<8x128xf32>
    %7 = arith.addf %4, %6 : vector<8x128xf32>
    %cst_6 = arith.constant 0.000000e+00 : f32
    %8 = vector.broadcast %cst_6 : f32 to vector<8x128xf32>
    %9 = arith.cmpf oge, %7, %8 : vector<8x128xf32>
    %cst_7 = arith.constant 0.00999999977 : f32
    %10 = vector.broadcast %cst_7 : f32 to vector<8x128xf32>
    %11 = arith.mulf %10, %7 : vector<8x128xf32>
    %12 = arith.select %9, %7, %11 : vector<8x128xi1>, vector<8x128xf32>
    %13 = vector.extract_strided_slice %12 {offsets = [0, 0], sizes = [1, 128], strides = [1, 1]} : vector<8x128xf32> to vector<1x128xf32>
    %14 = vector.broadcast %13 : vector<1x128xf32> to vector<8x128xf32>
    %15 = arith.subf %12, %14 : vector<8x128xf32>
    %cst_8 = arith.constant dense<0.000000e+00> : vector<128xf32>
    %16 = vector.multi_reduction <add>, %15, %cst_8 [0] : vector<8x128xf32> to vector<128xf32>
    %17 = vector.shape_cast %16 : vector<128xf32> to vector<1x128xf32>
    %18 = arith.mulf %15, %15 : vector<8x128xf32>
    %cst_9 = arith.constant dense<0.000000e+00> : vector<128xf32>
    %19 = vector.multi_reduction <add>, %18, %cst_9 [0] : vector<8x128xf32> to vector<128xf32>
    %20 = vector.shape_cast %19 : vector<128xf32> to vector<1x128xf32>
    %cst_10 = arith.constant 1.250000e-01 : f32
    %21 = vector.broadcast %cst_10 : f32 to vector<1x128xf32>
    %22 = arith.mulf %17, %21 : vector<1x128xf32>
    %cst_11 = arith.constant 1.250000e-01 : f32
    %23 = vector.broadcast %cst_11 : f32 to vector<1x128xf32>
    %24 = arith.mulf %20, %23 : vector<1x128xf32>
    %25 = arith.mulf %22, %22 : vector<1x128xf32>
    %26 = arith.subf %24, %25 : vector<1x128xf32>
    %cst_12 = arith.constant 0.000000e+00 : f32
    %27 = vector.broadcast %cst_12 : f32 to vector<1x128xf32>
    %28 = arith.maximumf %26, %27 : vector<1x128xf32>
    %29 = arith.addf %22, %13 : vector<1x128xf32>
    %30 = vector.extract_strided_slice %3 {offsets = [1, 0], sizes = [1, 128], strides = [1, 1]} : vector<3x128xf32> to vector<1x128xf32>
    %cst_13 = arith.constant 9.99999974E-6 : f32
    %31 = vector.broadcast %cst_13 : f32 to vector<1x128xf32>
    %32 = arith.addf %28, %31 : vector<1x128xf32>
    %33 = math.rsqrt %32 : vector<1x128xf32>
    %34 = arith.mulf %30, %33 : vector<1x128xf32>
    %35 = vector.extract_strided_slice %3 {offsets = [2, 0], sizes = [1, 128], strides = [1, 1]} : vector<3x128xf32> to vector<1x128xf32>
    %36 = arith.mulf %29, %34 : vector<1x128xf32>
    %37 = arith.subf %35, %36 : vector<1x128xf32>
    %38 = vector.broadcast %34 : vector<1x128xf32> to vector<8x128xf32>
    %39 = arith.mulf %12, %38 : vector<8x128xf32>
    %40 = vector.broadcast %37 : vector<1x128xf32> to vector<8x128xf32>
    %41 = arith.addf %39, %40 : vector<8x128xf32>
    %c0_14 = arith.constant 0 : index
    %c0_15 = arith.constant 0 : index
    %c0_16 = arith.constant 0 : index
    %42 = vector.load %arg2[%c0_14, %c0_15, %c0_16] : memref<2x128x128xf32, #tpu.memory_space<vmem>>, vector<1x128x128xf32>
    %43 = vector.shape_cast %42 : vector<1x128x128xf32> to vector<128x128xf32>
    %c1 = arith.constant 1 : index
    %c0_17 = arith.constant 0 : index
    %c0_18 = arith.constant 0 : index
    %44 = vector.load %arg3[%c1, %c0_17, %c0_18] : memref<3x3x128xf32, #tpu.memory_space<vmem>>, vector<1x3x128xf32>
    %45 = vector.shape_cast %44 : vector<1x3x128xf32> to vector<3x128xf32>
    %cst_19 = arith.constant dense<0.000000e+00> : vector<8x128xf32>
    %46 = tpu.matmul %41, %43, %cst_19 {dimension_numbers = #tpu.dot_dimension_numbers<[1], [0], [0], [1], [0, 0, 1, 1], [], []>} : vector<8x128xf32>, vector<128x128xf32>, vector<8x128xf32> -> vector<8x128xf32>
    %47 = vector.extract_strided_slice %45 {offsets = [0, 0], sizes = [1, 128], strides = [1, 1]} : vector<3x128xf32> to vector<1x128xf32>
    %48 = vector.broadcast %47 : vector<1x128xf32> to vector<8x128xf32>
    %49 = arith.addf %46, %48 : vector<8x128xf32>
    %cst_20 = arith.constant 0.000000e+00 : f32
    %50 = vector.broadcast %cst_20 : f32 to vector<8x128xf32>
    %51 = arith.cmpf oge, %49, %50 : vector<8x128xf32>
    %cst_21 = arith.constant 0.00999999977 : f32
    %52 = vector.broadcast %cst_21 : f32 to vector<8x128xf32>
    %53 = arith.mulf %52, %49 : vector<8x128xf32>
    %54 = arith.select %51, %49, %53 : vector<8x128xi1>, vector<8x128xf32>
    %55 = vector.extract_strided_slice %54 {offsets = [0, 0], sizes = [1, 128], strides = [1, 1]} : vector<8x128xf32> to vector<1x128xf32>
    %56 = vector.broadcast %55 : vector<1x128xf32> to vector<8x128xf32>
    %57 = arith.subf %54, %56 : vector<8x128xf32>
    %cst_22 = arith.constant dense<0.000000e+00> : vector<128xf32>
    %58 = vector.multi_reduction <add>, %57, %cst_22 [0] : vector<8x128xf32> to vector<128xf32>
    %59 = vector.shape_cast %58 : vector<128xf32> to vector<1x128xf32>
    %60 = arith.mulf %57, %57 : vector<8x128xf32>
    %cst_23 = arith.constant dense<0.000000e+00> : vector<128xf32>
    %61 = vector.multi_reduction <add>, %60, %cst_23 [0] : vector<8x128xf32> to vector<128xf32>
    %62 = vector.shape_cast %61 : vector<128xf32> to vector<1x128xf32>
    %cst_24 = arith.constant 1.250000e-01 : f32
    %63 = vector.broadcast %cst_24 : f32 to vector<1x128xf32>
    %64 = arith.mulf %59, %63 : vector<1x128xf32>
    %cst_25 = arith.constant 1.250000e-01 : f32
    %65 = vector.broadcast %cst_25 : f32 to vector<1x128xf32>
    %66 = arith.mulf %62, %65 : vector<1x128xf32>
    %67 = arith.mulf %64, %64 : vector<1x128xf32>
    %68 = arith.subf %66, %67 : vector<1x128xf32>
    %cst_26 = arith.constant 0.000000e+00 : f32
    %69 = vector.broadcast %cst_26 : f32 to vector<1x128xf32>
    %70 = arith.maximumf %68, %69 : vector<1x128xf32>
    %71 = arith.addf %64, %55 : vector<1x128xf32>
    %72 = vector.extract_strided_slice %45 {offsets = [1, 0], sizes = [1, 128], strides = [1, 1]} : vector<3x128xf32> to vector<1x128xf32>
    %cst_27 = arith.constant 9.99999974E-6 : f32
    %73 = vector.broadcast %cst_27 : f32 to vector<1x128xf32>
    %74 = arith.addf %70, %73 : vector<1x128xf32>
    %75 = math.rsqrt %74 : vector<1x128xf32>
    %76 = arith.mulf %72, %75 : vector<1x128xf32>
    %77 = vector.extract_strided_slice %45 {offsets = [2, 0], sizes = [1, 128], strides = [1, 1]} : vector<3x128xf32> to vector<1x128xf32>
    %78 = arith.mulf %71, %76 : vector<1x128xf32>
    %79 = arith.subf %77, %78 : vector<1x128xf32>
    %80 = vector.broadcast %76 : vector<1x128xf32> to vector<8x128xf32>
    %81 = arith.mulf %54, %80 : vector<8x128xf32>
    %82 = vector.broadcast %79 : vector<1x128xf32> to vector<8x128xf32>
    %83 = arith.addf %81, %82 : vector<8x128xf32>
    %c1_28 = arith.constant 1 : index
    %c0_29 = arith.constant 0 : index
    %c0_30 = arith.constant 0 : index
    %84 = vector.load %arg2[%c1_28, %c0_29, %c0_30] : memref<2x128x128xf32, #tpu.memory_space<vmem>>, vector<1x128x128xf32>
    %85 = vector.shape_cast %84 : vector<1x128x128xf32> to vector<128x128xf32>
    %c2 = arith.constant 2 : index
    %c0_31 = arith.constant 0 : index
    %c0_32 = arith.constant 0 : index
    %86 = vector.load %arg3[%c2, %c0_31, %c0_32] : memref<3x3x128xf32, #tpu.memory_space<vmem>>, vector<1x3x128xf32>
    %87 = vector.shape_cast %86 : vector<1x3x128xf32> to vector<3x128xf32>
    %cst_33 = arith.constant dense<0.000000e+00> : vector<8x128xf32>
    %88 = tpu.matmul %83, %85, %cst_33 {dimension_numbers = #tpu.dot_dimension_numbers<[1], [0], [0], [1], [0, 0, 1, 1], [], []>} : vector<8x128xf32>, vector<128x128xf32>, vector<8x128xf32> -> vector<8x128xf32>
    %89 = vector.extract_strided_slice %87 {offsets = [0, 0], sizes = [1, 128], strides = [1, 1]} : vector<3x128xf32> to vector<1x128xf32>
    %90 = vector.broadcast %89 : vector<1x128xf32> to vector<8x128xf32>
    %91 = arith.addf %88, %90 : vector<8x128xf32>
    %cst_34 = arith.constant 0.000000e+00 : f32
    %92 = vector.broadcast %cst_34 : f32 to vector<8x128xf32>
    %93 = arith.cmpf oge, %91, %92 : vector<8x128xf32>
    %cst_35 = arith.constant 0.00999999977 : f32
    %94 = vector.broadcast %cst_35 : f32 to vector<8x128xf32>
    %95 = arith.mulf %94, %91 : vector<8x128xf32>
    %96 = arith.select %93, %91, %95 : vector<8x128xi1>, vector<8x128xf32>
    %97 = vector.extract_strided_slice %96 {offsets = [0, 0], sizes = [1, 128], strides = [1, 1]} : vector<8x128xf32> to vector<1x128xf32>
    %98 = vector.broadcast %97 : vector<1x128xf32> to vector<8x128xf32>
    %99 = arith.subf %96, %98 : vector<8x128xf32>
    %cst_36 = arith.constant dense<0.000000e+00> : vector<128xf32>
    %100 = vector.multi_reduction <add>, %99, %cst_36 [0] : vector<8x128xf32> to vector<128xf32>
    %101 = vector.shape_cast %100 : vector<128xf32> to vector<1x128xf32>
    %102 = arith.mulf %99, %99 : vector<8x128xf32>
    %cst_37 = arith.constant dense<0.000000e+00> : vector<128xf32>
    %103 = vector.multi_reduction <add>, %102, %cst_37 [0] : vector<8x128xf32> to vector<128xf32>
    %104 = vector.shape_cast %103 : vector<128xf32> to vector<1x128xf32>
    %cst_38 = arith.constant 1.250000e-01 : f32
    %105 = vector.broadcast %cst_38 : f32 to vector<1x128xf32>
    %106 = arith.mulf %101, %105 : vector<1x128xf32>
    %cst_39 = arith.constant 1.250000e-01 : f32
    %107 = vector.broadcast %cst_39 : f32 to vector<1x128xf32>
    %108 = arith.mulf %104, %107 : vector<1x128xf32>
    %109 = arith.mulf %106, %106 : vector<1x128xf32>
    %110 = arith.subf %108, %109 : vector<1x128xf32>
    %cst_40 = arith.constant 0.000000e+00 : f32
    %111 = vector.broadcast %cst_40 : f32 to vector<1x128xf32>
    %112 = arith.maximumf %110, %111 : vector<1x128xf32>
    %113 = arith.addf %106, %97 : vector<1x128xf32>
    %114 = vector.extract_strided_slice %87 {offsets = [1, 0], sizes = [1, 128], strides = [1, 1]} : vector<3x128xf32> to vector<1x128xf32>
    %cst_41 = arith.constant 9.99999974E-6 : f32
    %115 = vector.broadcast %cst_41 : f32 to vector<1x128xf32>
    %116 = arith.addf %112, %115 : vector<1x128xf32>
    %117 = math.rsqrt %116 : vector<1x128xf32>
    %118 = arith.mulf %114, %117 : vector<1x128xf32>
    %119 = vector.extract_strided_slice %87 {offsets = [2, 0], sizes = [1, 128], strides = [1, 1]} : vector<3x128xf32> to vector<1x128xf32>
    %120 = arith.mulf %113, %118 : vector<1x128xf32>
    %121 = arith.subf %119, %120 : vector<1x128xf32>
    %122 = vector.broadcast %118 : vector<1x128xf32> to vector<8x128xf32>
    %123 = arith.mulf %96, %122 : vector<8x128xf32>
    %124 = vector.broadcast %121 : vector<1x128xf32> to vector<8x128xf32>
    %125 = arith.addf %123, %124 : vector<8x128xf32>
    %c0_42 = arith.constant 0 : index
    %c0_43 = arith.constant 0 : index
    %126 = vector.load %arg4[%c0_42, %c0_43] : memref<128x128xf32, #tpu.memory_space<vmem>>, vector<128x128xf32>
    %c0_44 = arith.constant 0 : index
    %c0_45 = arith.constant 0 : index
    %127 = vector.load %arg5[%c0_44, %c0_45] : memref<1x128xf32, #tpu.memory_space<vmem>>, vector<1x128xf32>
    %cst_46 = arith.constant dense<0.000000e+00> : vector<8x128xf32>
    %128 = tpu.matmul %125, %126, %cst_46 {dimension_numbers = #tpu.dot_dimension_numbers<[1], [0], [0], [1], [0, 0, 1, 1], [], []>} : vector<8x128xf32>, vector<128x128xf32>, vector<8x128xf32> -> vector<8x128xf32>
    %129 = vector.broadcast %127 : vector<1x128xf32> to vector<8x128xf32>
    %130 = arith.addf %128, %129 : vector<8x128xf32>
    %c0_47 = arith.constant 0 : index
    %c0_48 = arith.constant 0 : index
    %131 = vector.load %arg6[%c0_47, %c0_48] : memref<8x128xf32, #tpu.memory_space<vmem>>, vector<8x128xf32>
    tpu.vector_store %arg6[%c0_47, %c0_48], %130 {strides = array<i32>} : memref<8x128xf32, #tpu.memory_space<vmem>>, vector<8x128xf32>,
    return
  }
}

</mosaic_0001>

<bundles_post_ra>
// kernel: tpu_custom_call.1
= control target key start
LH: loop header
LB: loop body
LE: loop exit
PB: predicated region body
PF: predicated region fallthrough
CT: control target
= control target key end

     0   :  { %11 = vsyncpa [#allocation3], 0  ;;  %s1144_s0 = inlined_call_operand.hbm [shape: f32[8,128], index: 0, kind: input, shape index: {}]   ;;  %s1145_s1 = inlined_call_operand.hbm [shape: f32[128,128], index: 1, kind: input, shape index: {}]   ;;  %s1146_s2 = inlined_call_operand.hbm [shape: f32[2,128,128], index: 2, kind: input, shape index: {}]   ;;  %s1147_s3 = inlined_call_operand.hbm [shape: f32[3,3,128], index: 3, kind: input, shape index: {}]   ;;  %s1148_s4 = inlined_call_operand.hbm [shape: f32[128,128], index: 4, kind: input, shape index: {}]   ;;  %s1149_s5 = inlined_call_operand.vmem [shape: f32[1,128], index: 5, kind: input, shape index: {}]   ;;  %s1150_s6 = inlined_call_operand.hbm [shape: f32[8,128], index: 6, kind: output, shape index: {}]  }
   0x1   :  { %12 = vsyncpa [#allocation6], 0 }
   0x2   :  { %13 = vsyncpa [#allocation9], 0 }
   0x3   :  { %14 = vsyncpa [#allocation4], 0  ;;  %s977_s21 = smov [#allocation5]  }
   0x4   :  { %s30_s22 = sshll.u32 %s977_s21, 4  ;;  %s31_s22 = int_to_ptr.vmem [resolvable:$true] %s30_s22 }
   0x5   :  { %s857_s23 = scalar_lea.vmem %s31_s22, 2048  ;;  %p862_p1 = scmp.lt.s32.totalorder %s31_s22, %s31_s22 }
   0x6   :  { %p858_p0 = scmp.ne.s32.totalorder %s31_s22, %s857_s23  ;;  %p863_p2 = scmp.lt.s32.totalorder %s857_s23, %s857_s23 }
   0x8   :  { %p864_p3 = por %p863_p2, %p862_p1 }
   0xa   :  { %p865_p4 = pnand %p864_p3, %p858_p0 }
   0xc   :  { %868 = shalt.err (!%p865_p4)
}
   0xd   :  { %s978_s24 = smov 128   ;;  %s979_s25 = smov 8  }
   0xe   :  { %36 = dma.hbm_to_vmem [thread:$0]  %s1145_s1, 2048, %s31_s22, [#allocation6], %s978_s24, %s978_s24, %s979_s25  }
   0xf   :  { %s980_s28 = smov [#allocation8]  }
  0x10   :  { %s54_s29 = sshll.u32 %s980_s28, 4  ;;  %s55_s29 = int_to_ptr.vmem [resolvable:$true] %s54_s29 }
  0x11   :  { %s877_s30 = scalar_lea.vmem %s55_s29, 192  ;;  %p882_p6 = scmp.lt.s32.totalorder %s55_s29, %s55_s29 }
  0x12   :  { %p878_p5 = scmp.ne.s32.totalorder %s55_s29, %s877_s30  ;;  %p883_p7 = scmp.lt.s32.totalorder %s877_s30, %s877_s30 }
  0x14   :  { %p884_p8 = por %p883_p7, %p882_p6 }
  0x16   :  { %p885_p9 = pnand %p884_p8, %p878_p5 }
  0x18   :  { %888 = shalt.err (!%p885_p9)
}
  0x19   :  { %s981_s7 = smov 64   ;;  %s982_s8 = smov 4  }
  0x1a   :  { %60 = dma.hbm_to_vmem [thread:$0]  %s1147_s3, 192, %s55_s29, [#allocation9], %s981_s7, %s981_s7, %s982_s8  }
  0x1b   :  { %s983_s11 = smov [#allocation2]   ;;  %s984_s13 = smov [#allocation7]  }
  0x1c   :  { %s21_s12 = sshll.u32 %s983_s11, 4  ;;  %s42_s1 = sshll.u32 %s984_s13, 4  ;;  %s22_s12 = int_to_ptr.vmem [resolvable:$true] %s21_s12  ;;  %s43_s1 = int_to_ptr.vmem [resolvable:$true] %s42_s1 }
  0x1d   :  { %s897_s14 = scalar_lea.vmem %s22_s12, 128  ;;  %p902_p11 = scmp.lt.s32.totalorder %s22_s12, %s22_s12 }
  0x1e   :  { %p898_p10 = scmp.ne.s32.totalorder %s22_s12, %s897_s14  ;;  %p903_p12 = scmp.lt.s32.totalorder %s897_s14, %s897_s14 }
  0x20   :  { %p904_p13 = por %p903_p12, %p902_p11 }
  0x22   :  { %p905_p0 = pnand %p904_p13, %p898_p10 }
  0x24   :  { %908 = shalt.err (!%p905_p0)
}
  0x25   :  { %24 = dma.hbm_to_vmem [thread:$0]  %s1144_s0, 128, %s22_s12, [#allocation3]  }
  0x26   :  { %s917_s17 = scalar_lea.vmem %s43_s1, 4096  ;;  %p922_p2 = scmp.lt.s32.totalorder %s43_s1, %s43_s1 }
  0x27   :  { %p918_p1 = scmp.ne.s32.totalorder %s43_s1, %s917_s17  ;;  %p923_p3 = scmp.lt.s32.totalorder %s917_s17, %s917_s17 }
  0x29   :  { %p924_p4 = por %p923_p3, %p922_p2 }
  0x2b   :  { %p925_p5 = pnand %p924_p4, %p918_p1 }
  0x2d   :  { %928 = shalt.err (!%p925_p5)
}
  0x2e   :  { %48 = dma.hbm_to_vmem [thread:$0]  %s1146_s2, 4096, %s43_s1, [#allocation6], %s978_s24, %s978_s24, %s979_s25  }
  0x2f   :  { %s985_s19 = smov [#allocation10]  }
  0x30   :  { %s66_s20 = sshll.u32 %s985_s19, 4  ;;  %s67_s20 = int_to_ptr.vmem [resolvable:$true] %s66_s20 }
  0x31   :  { %s937_s21 = scalar_lea.vmem %s67_s20, 2048  ;;  %p942_p7 = scmp.lt.s32.totalorder %s67_s20, %s67_s20 }
  0x32   :  { %p938_p6 = scmp.ne.s32.totalorder %s67_s20, %s937_s21  ;;  %p943_p8 = scmp.lt.s32.totalorder %s937_s21, %s937_s21 }
  0x34   :  { %p944_p9 = por %p943_p8, %p942_p7 }
  0x36   :  { %p945_p10 = pnand %p944_p9, %p938_p6 }
  0x38   :  { %948 = shalt.err (!%p945_p10)
}
  0x39   :  { %72 = dma.hbm_to_vmem [thread:$0]  %s1148_s4, 2048, %s67_s20, [#allocation9], %s978_s24, %s978_s24, %s979_s25  }
  0x3a   :  { %969 = dma.done.wait [#allocation3], 128  }
  0x3b   :  { %970 = vsyncadd [#allocation3], 4294967168 }
  0x3c   :  { %971 = dma.done.wait [#allocation6], 6144  }
  0x3d   :  { %972 = vsyncadd [#allocation6], 4294961152 }
  0x3e   :  { %973 = dma.done.wait [#allocation9], 2240  }
  0x3f   :  { %974 = vsyncadd [#allocation9], 4294965056  ;;  %v986_v0 = vmov 0.0   ;;  %vm987_vm0 = vmmov 0   ;;  %v106_v1 = vld [vmem:[#allocation5 + $0x78] sm:$0xff]  ;;  %v105_v2 = vld [vmem:[#allocation5 + $0x70] sm:$0xff]  ;;  %v108_v34 = vlaneseq }
  0x40   :  { %691 = vmatprep.subr.mxu0 %v986_v0  ;;  %723 = vmatprep.mubr.msk.f32.mxu0 %vm987_vm0, %v986_v0  ;;  %v104_v3 = vld [vmem:[#allocation5 + $0x68] sm:$0xff]  ;;  %v103_v4 = vld [vmem:[#allocation5 + $0x60] sm:$0xff]  ;;  %v102_v5 = vld [vmem:[#allocation5 + $0x58] sm:$0xff]  ;;  %s988_s23 = smov [#allocation11]  }
  0x41   :  { %726 = vmatprep.subr.mxu1 %v986_v0  ;;  %758 = vmatprep.mubr.msk.f32.mxu1 %vm987_vm0, %v986_v0  ;;  %v101_v6 = vld [vmem:[#allocation5 + $0x50] sm:$0xff]  ;;  %v100_v7 = vld [vmem:[#allocation5 + $0x48] sm:$0xff]  ;;  %v99_v8 = vld [vmem:[#allocation5 + $0x40] sm:$0xff]  ;;  %v109_v35 = vshrl.u32 %v108_v34, 7  ;;  %s611_s24 = sshll.u32 %s988_s23, 4  ;;  %s612_s24 = int_to_ptr.vmem [resolvable:$true] %s611_s24 }
  0x42   :  { %692 = vmatpush3.msra.mxu0 %v106_v1  ;;  %v98_v9 = vld [vmem:[#allocation5 + $0x38] sm:$0xff]  ;;  %v97_v10 = vld [vmem:[#allocation5 + $0x30] sm:$0xff]  ;;  %v96_v11 = vld [vmem:[#allocation5 + $0x28] sm:$0xff]  ;;  %s949_s25 = scalar_lea.vmem %s612_s24, 128  ;;  %p954_p12 = scmp.lt.s32.totalorder %s612_s24, %s612_s24 }
  0x43   :  { %693 = vmatprep.subr.mxu0 %v986_v0  ;;  %v95_v12 = vld [vmem:[#allocation5 + $0x20] sm:$0xff]  ;;  %v94_v13 = vld [vmem:[#allocation5 + $0x18] sm:$0xff]  ;;  %v93_v14 = vld [vmem:[#allocation5 + $0x10] sm:$0xff]  ;;  %v1088_v36 = vsub.s32 0, %v109_v35  ;;  %p950_p11 = scmp.ne.s32.totalorder %s612_s24, %s949_s25  ;;  %p955_p13 = scmp.lt.s32.totalorder %s949_s25, %s949_s25 }
  0x44   :  { %694 = vmatpush3.msra.mxu0 %v105_v2  ;;  %v92_v15 = vld [vmem:[#allocation5 + $0x8] sm:$0xff]  ;;  %v91_v16 = vld [vmem:[#allocation5] sm:$0xff]  ;;  %v90_v17 = vld [vmem:[#allocation2] sm:$0xff] }
  0x45   :  { %695 = vmatprep.subr.mxu0 %v986_v0  ;;  %v245_v18 = vld [vmem:[#allocation7 + $0x78] sm:$0xff]  ;;  %v244_v19 = vld [vmem:[#allocation7 + $0x70] sm:$0xff]  ;;  %v243_v20 = vld [vmem:[#allocation7 + $0x68] sm:$0xff]  ;;  %p956_p0 = por %p955_p13, %p954_p12 }
  0x46   :  { %696 = vmatpush3.msra.mxu0 %v104_v3  ;;  %727 = vmatpush3.msra.mxu1 %v245_v18  ;;  %v242_v21 = vld [vmem:[#allocation7 + $0x60] sm:$0xff]  ;;  %v241_v22 = vld [vmem:[#allocation7 + $0x58] sm:$0xff]  ;;  %v240_v23 = vld [vmem:[#allocation7 + $0x50] sm:$0xff] }
  0x47   :  { %697 = vmatprep.subr.mxu0 %v986_v0  ;;  %728 = vmatprep.subr.mxu1 %v986_v0  ;;  %v239_v24 = vld [vmem:[#allocation7 + $0x48] sm:$0xff]  ;;  %v238_v25 = vld [vmem:[#allocation7 + $0x40] sm:$0xff]  ;;  %v237_v26 = vld [vmem:[#allocation7 + $0x38] sm:$0xff]  ;;  %p957_p1 = pnand %p956_p0, %p950_p11 }
  0x48   :  { %698 = vmatpush3.msra.mxu0 %v103_v4  ;;  %729 = vmatpush3.msra.mxu1 %v244_v19  ;;  %v236_v27 = vld [vmem:[#allocation7 + $0x30] sm:$0xff]  ;;  %v235_v28 = vld [vmem:[#allocation7 + $0x28] sm:$0xff]  ;;  %v234_v29 = vld [vmem:[#allocation7 + $0x20] sm:$0xff] }
  0x49   :  { %699 = vmatprep.subr.mxu0 %v986_v0  ;;  %730 = vmatprep.subr.mxu1 %v986_v0  ;;  %v233_v30 = vld [vmem:[#allocation7 + $0x18] sm:$0xff]  ;;  %v232_v31 = vld [vmem:[#allocation7 + $0x10] sm:$0xff]  ;;  %v231_v32 = vld [vmem:[#allocation7 + $0x8] sm:$0xff] }
  0x4a   :  { %700 = vmatpush3.msra.mxu0 %v102_v5  ;;  %731 = vmatpush3.msra.mxu1 %v243_v20  ;;  %v230_v33 = vld [vmem:[#allocation7] sm:$0xff]  ;;  %v382_v19 = vld [vmem:[#allocation7 + $0xd8] sm:$0xff]  ;;  %v381_v20 = vld [vmem:[#allocation7 + $0xd0] sm:$0xff] }
  0x4b   :  { %701 = vmatprep.subr.mxu0 %v986_v0  ;;  %732 = vmatprep.subr.mxu1 %v986_v0  ;;  %v107_v37 = vld [vmem:[#allocation8] sm:$0x7] }
  0x4c   :  { %702 = vmatpush3.msra.mxu0 %v101_v6  ;;  %733 = vmatpush3.msra.mxu1 %v242_v21  ;;  %v111_v38 = vrot.slane %v107_v37, %v1088_v36  ;;  %v1092_v6 = vsub.s32 1, %v109_v35  ;;  %v383_v18 = vld [vmem:[#allocation7 + $0xe0] sm:$0xff]  ;;  %v380_v21 = vld [vmem:[#allocation7 + $0xc8] sm:$0xff] }
  0x4d   :  { %703 = vmatprep.subr.mxu0 %v986_v0  ;;  %734 = vmatprep.subr.mxu1 %v986_v0 }
  0x4e   :  { %704 = vmatpush3.msra.mxu0 %v100_v7  ;;  %735 = vmatpush3.msra.mxu1 %v241_v22  ;;  %v379_v22 = vld [vmem:[#allocation7 + $0xc0] sm:$0xff] }
  0x4f   :  { %705 = vmatprep.subr.mxu0 %v986_v0  ;;  %736 = vmatprep.subr.mxu1 %v986_v0 }
  0x50   :  { %706 = vmatpush3.msra.mxu0 %v99_v8  ;;  %737 = vmatpush3.msra.mxu1 %v240_v23  ;;  %v378_v23 = vld [vmem:[#allocation7 + $0xb8] sm:$0xff] }
  0x51   :  { %707 = vmatprep.subr.mxu0 %v986_v0  ;;  %738 = vmatprep.subr.mxu1 %v986_v0 }
  0x52   :  { %708 = vmatpush3.msra.mxu0 %v98_v9  ;;  %739 = vmatpush3.msra.mxu1 %v239_v24  ;;  %v377_v24 = vld [vmem:[#allocation7 + $0xb0] sm:$0xff] }
  0x53   :  { %709 = vmatprep.subr.mxu0 %v986_v0  ;;  %740 = vmatprep.subr.mxu1 %v986_v0 }
  0x54   :  { %710 = vmatpush3.msra.mxu0 %v97_v10  ;;  %741 = vmatpush3.msra.mxu1 %v238_v25  ;;  %v1095_v10 = vsub.s32 2, %v109_v35  ;;  %v376_v25 = vld [vmem:[#allocation7 + $0xa8] sm:$0xff] }
  0x55   :  { %711 = vmatprep.subr.mxu0 %v986_v0  ;;  %742 = vmatprep.subr.mxu1 %v986_v0 }
  0x56   :  { %712 = vmatpush3.msra.mxu0 %v96_v11  ;;  %743 = vmatpush3.msra.mxu1 %v237_v26  ;;  %v375_v26 = vld [vmem:[#allocation7 + $0xa0] sm:$0xff] }
  0x57   :  { %713 = vmatprep.subr.mxu0 %v986_v0  ;;  %744 = vmatprep.subr.mxu1 %v986_v0 }
  0x58   :  { %714 = vmatpush3.msra.mxu0 %v95_v12  ;;  %745 = vmatpush3.msra.mxu1 %v236_v27  ;;  %v374_v27 = vld [vmem:[#allocation7 + $0x98] sm:$0xff] }
  0x59   :  { %715 = vmatprep.subr.mxu0 %v986_v0  ;;  %746 = vmatprep.subr.mxu1 %v986_v0 }
  0x5a   :  { %716 = vmatpush3.msra.mxu0 %v94_v13  ;;  %747 = vmatpush3.msra.mxu1 %v235_v28  ;;  %v373_v28 = vld [vmem:[#allocation7 + $0x90] sm:$0xff] }
  0x5b   :  { %717 = vmatprep.subr.mxu0 %v986_v0  ;;  %748 = vmatprep.subr.mxu1 %v986_v0 }
  0x5c   :  { %718 = vmatpush3.msra.mxu0 %v93_v14  ;;  %749 = vmatpush3.msra.mxu1 %v234_v29  ;;  %v372_v29 = vld [vmem:[#allocation7 + $0x88] sm:$0xff] }
  0x5d   :  { %719 = vmatprep.subr.mxu0 %v986_v0  ;;  %750 = vmatprep.subr.mxu1 %v986_v0 }
  0x5e   :  { %720 = vmatpush3.msra.mxu0 %v92_v15  ;;  %751 = vmatpush3.msra.mxu1 %v233_v30  ;;  %v386_v15 = vld [vmem:[#allocation7 + $0xf8] sm:$0xff]  ;;  %v371_v30 = vld [vmem:[#allocation7 + $0x80] sm:$0xff] }
  0x5f   :  { %721 = vmatprep.subr.mxu0 %v986_v0  ;;  %752 = vmatprep.subr.mxu1 %v986_v0 }
  0x60   :  { %722 = vmatpush3.msra.mxu0 %v91_v16  ;;  %753 = vmatpush3.msra.mxu1 %v232_v31  ;;  %v385_v16 = vld [vmem:[#allocation7 + $0xf0] sm:$0xff]  ;;  %v247_v31 = vld [vmem:[#allocation8 + $0x4] sm:$0x7] }
  0x61   :  { %724 = vmatmul.mubr.f32.vlgmr.msra.gmra.mxu0 %v90_v17  ;;  %761 = vmatprep.subr.mxu0 %v986_v0  ;;  %v384_v17 = vld [vmem:[#allocation7 + $0xe8] sm:$0xff] }
  0x62   :  { %793 = vmatprep.mubr.msk.f32.mxu0 %vm987_vm0, %v986_v0  ;;  %754 = vmatprep.subr.mxu1 %v986_v0 }
  0x63   :  { %755 = vmatpush3.msra.mxu1 %v231_v32  ;;  %762 = vmatpush3.msra.mxu0 %v386_v15  ;;  %v251_v32 = vrot.slane %v247_v31, %v1088_v36  ;;  %v521_v15 = vld [vmem:[#allocation10 + $0x50] sm:$0xff] }
  0x64   :  { %756 = vmatprep.subr.mxu1 %v986_v0  ;;  %763 = vmatprep.subr.mxu0 %v986_v0 }
  0x65   :  { %757 = vmatpush3.msra.mxu1 %v230_v33  ;;  %764 = vmatpush3.msra.mxu0 %v385_v16  ;;  %v520_v16 = vld [vmem:[#allocation10 + $0x48] sm:$0xff] }
  0x66   :  { %796 = vmatprep.subr.mxu1 %v986_v0  ;;  %765 = vmatprep.subr.mxu0 %v986_v0 }
  0x67   :  { %766 = vmatpush3.msra.mxu0 %v384_v17  ;;  %v519_v17 = vld [vmem:[#allocation10 + $0x40] sm:$0xff] }
  0x68   :  { %767 = vmatprep.subr.mxu0 %v986_v0 }
  0x69   :  { %768 = vmatpush3.msra.mxu0 %v383_v18  ;;  %v518_v18 = vld [vmem:[#allocation10 + $0x38] sm:$0xff] }
  0x6a   :  { %769 = vmatprep.subr.mxu0 %v986_v0 }
  0x6b   :  { %770 = vmatpush3.msra.mxu0 %v382_v19  ;;  %v517_v19 = vld [vmem:[#allocation10 + $0x30] sm:$0xff] }
  0x6c   :  { %771 = vmatprep.subr.mxu0 %v986_v0 }
  0x6d   :  { %772 = vmatpush3.msra.mxu0 %v381_v20  ;;  %v516_v20 = vld [vmem:[#allocation10 + $0x28] sm:$0xff] }
  0x6e   :  { %773 = vmatprep.subr.mxu0 %v986_v0 }
  0x6f   :  { %774 = vmatpush3.msra.mxu0 %v380_v21  ;;  %v515_v21 = vld [vmem:[#allocation10 + $0x20] sm:$0xff] }
  0x70   :  { %775 = vmatprep.subr.mxu0 %v986_v0 }
  0x71   :  { %776 = vmatpush3.msra.mxu0 %v379_v22  ;;  %v514_v22 = vld [vmem:[#allocation10 + $0x18] sm:$0xff] }
  0x72   :  { %777 = vmatprep.subr.mxu0 %v986_v0 }
  0x73   :  { %778 = vmatpush3.msra.mxu0 %v378_v23  ;;  %v513_v23 = vld [vmem:[#allocation10 + $0x10] sm:$0xff] }
  0x74   :  { %779 = vmatprep.subr.mxu0 %v986_v0 }
  0x75   :  { %780 = vmatpush3.msra.mxu0 %v377_v24  ;;  %v512_v24 = vld [vmem:[#allocation10 + $0x8] sm:$0xff] }
  0x76   :  { %781 = vmatprep.subr.mxu0 %v986_v0 }
  0x77   :  { %782 = vmatpush3.msra.mxu0 %v376_v25  ;;  %v511_v25 = vld [vmem:[#allocation10] sm:$0xff] }
  0x78   :  { %783 = vmatprep.subr.mxu0 %v986_v0 }
  0x79   :  { %784 = vmatpush3.msra.mxu0 %v375_v26  ;;  %v388_v26 = vld [vmem:[#allocation8 + $0x8] sm:$0x7] }
  0x7a   :  { %785 = vmatprep.subr.mxu0 %v986_v0 }
  0x7b   :  { %786 = vmatpush3.msra.mxu0 %v374_v27  ;;  %v392_v27 = vrot.slane %v388_v26, %v1088_v36 }
  0x7c   :  { %787 = vmatprep.subr.mxu0 %v986_v0 }
  0x7d   :  { %788 = vmatpush3.msra.mxu0 %v373_v28 }
  0x7e   :  { %789 = vmatprep.subr.mxu0 %v986_v0 }
  0x7f   :  { %790 = vmatpush3.msra.mxu0 %v372_v29 }
  0x80   :  { %791 = vmatprep.subr.mxu0 %v986_v0 }
  0x81   :  { %792 = vmatpush3.msra.mxu0 %v371_v30 }
 0x121   :  { %v178_v39 = vpop.f32.mrf.mxu0 }
 0x122   :  { %v179_v40 = vadd.f32 %v178_v39, %v111_v38 }
 0x123   :  { %v725_v41 = vpop.f32.mrf.mxu0 }
 0x124   :  { %vm182_vm1 = vcmp.ge.f32.partialorder %v179_v40, 0.0  ;;  %v183_v42 = vmul.f32 0.01, %v179_v40 }
 0x126   :  { %v184_v43 = vsel %vm182_vm1, %v179_v40, %v183_v42 }
 0x127   :  { %v188_v44 = vrot.slane %v184_v43, %v1088_v36 }
 0x129   :  { %v189_v45 = vsub.f32 %v184_v43, %v188_v44 }
 0x12b   :  { %v190_v46 = vrot.slane %v189_v45, 4  ;;  %v196_v47 = vmul.f32 %v189_v45, %v189_v45 }
 0x12d   :  { %v191_v48 = vadd.f32 %v190_v46, %v189_v45  ;;  %v197_v49 = vrot.slane %v196_v47, 4 }
 0x12f   :  { %v192_v50 = vrot.slane %v191_v48, 2  ;;  %v198_v51 = vadd.f32 %v197_v49, %v196_v47 }
 0x131   :  { %v193_v52 = vadd.f32 %v192_v50, %v191_v48  ;;  %v199_v53 = vrot.slane %v198_v51, 2 }
 0x133   :  { %v194_v54 = vrot.slane %v193_v52, 1  ;;  %v200_v55 = vadd.f32 %v199_v53, %v198_v51 }
 0x135   :  { %v195_v56 = vadd.f32 %v194_v54, %v193_v52  ;;  %v201_v57 = vrot.slane %v200_v55, 1 }
 0x137   :  { %v202_v58 = vadd.f32 %v201_v57, %v200_v55  ;;  %v203_v59 = vmul.f32 0.125, %v195_v56 }
 0x139   :  { %v204_v60 = vmul.f32 0.125, %v202_v58  ;;  %v205_v61 = vmul.f32 %v203_v59, %v203_v59  ;;  %v208_v4 = vadd.f32 %v203_v59, %v184_v43 }
 0x13b   :  { %v206_v62 = vsub.f32 %v204_v60, %v205_v61 }
 0x13d   :  { %v207_v63 = vmax.f32 %v206_v62, 0.0 }
 0x13f   :  { %v209_v1 = vadd.f32 1e-05, %v207_v63 }
 0x141   :  { %843 = vrsqrt.f32 %v209_v1 }
 0x14e   :  { %v844_v2 = vpop.eup %843 }
 0x14f   :  { %v211_v3 = vmul.f32 %v844_v2, %v107_v37 }
 0x151   :  { %v213_v5 = vrot.slane %v211_v3, 1  ;;  %v223_v9 = vrot.slane %v211_v3, %v1092_v6 }
 0x153   :  { %v215_v7 = vmul.f32 %v213_v5, %v208_v4  ;;  %v224_v12 = vmul.f32 %v223_v9, %v184_v43  ;;  %v526_v9 = vld [vmem:[#allocation10 + $0x78] sm:$0xff] }
 0x155   :  { %v217_v8 = vrot.slane %v215_v7, 6 }
 0x157   :  { %v219_v11 = vsub.f32 %v107_v37, %v217_v8 }
 0x159   :  { %v228_v13 = vrot.slane %v219_v11, %v1095_v10  ;;  %v525_v11 = vld [vmem:[#allocation10 + $0x70] sm:$0xff] }
 0x15b   :  { %v229_v14 = vadd.f32 %v228_v13, %v224_v12  ;;  %v524_v12 = vld [vmem:[#allocation10 + $0x68] sm:$0xff]  ;;  %v523_v13 = vld [vmem:[#allocation10 + $0x60] sm:$0xff] }
 0x15d   :  { %759 = vmatmul.mubr.f32.vlgmr.msra.gmra.mxu1 %v229_v14  ;;  %v522_v14 = vld [vmem:[#allocation10 + $0x58] sm:$0xff] }
 0x15e   :  { %828 = vmatprep.mubr.msk.f32.mxu1 %vm987_vm0, %v986_v0  ;;  %797 = vmatpush3.msra.mxu1 %v526_v9 }
 0x15f   :  { %798 = vmatprep.subr.mxu1 %v986_v0 }
 0x160   :  { %799 = vmatpush3.msra.mxu1 %v525_v11 }
 0x161   :  { %800 = vmatprep.subr.mxu1 %v986_v0 }
 0x162   :  { %801 = vmatpush3.msra.mxu1 %v524_v12 }
 0x163   :  { %802 = vmatprep.subr.mxu1 %v986_v0 }
 0x164   :  { %803 = vmatpush3.msra.mxu1 %v523_v13 }
 0x165   :  { %804 = vmatprep.subr.mxu1 %v986_v0 }
 0x166   :  { %805 = vmatpush3.msra.mxu1 %v522_v14 }
 0x167   :  { %806 = vmatprep.subr.mxu1 %v986_v0 }
 0x168   :  { %807 = vmatpush3.msra.mxu1 %v521_v15 }
 0x169   :  { %808 = vmatprep.subr.mxu1 %v986_v0 }
 0x16a   :  { %809 = vmatpush3.msra.mxu1 %v520_v16 }
 0x16b   :  { %810 = vmatprep.subr.mxu1 %v986_v0 }
 0x16c   :  { %811 = vmatpush3.msra.mxu1 %v519_v17 }
 0x16d   :  { %812 = vmatprep.subr.mxu1 %v986_v0 }
 0x16e   :  { %813 = vmatpush3.msra.mxu1 %v518_v18 }
 0x16f   :  { %814 = vmatprep.subr.mxu1 %v986_v0 }
 0x170   :  { %815 = vmatpush3.msra.mxu1 %v517_v19 }
 0x171   :  { %816 = vmatprep.subr.mxu1 %v986_v0 }
 0x172   :  { %817 = vmatpush3.msra.mxu1 %v516_v20 }
 0x173   :  { %818 = vmatprep.subr.mxu1 %v986_v0 }
 0x174   :  { %819 = vmatpush3.msra.mxu1 %v515_v21 }
 0x175   :  { %820 = vmatprep.subr.mxu1 %v986_v0 }
 0x176   :  { %821 = vmatpush3.msra.mxu1 %v514_v22 }
 0x177   :  { %822 = vmatprep.subr.mxu1 %v986_v0 }
 0x178   :  { %823 = vmatpush3.msra.mxu1 %v513_v23 }
 0x179   :  { %824 = vmatprep.subr.mxu1 %v986_v0 }
 0x17a   :  { %825 = vmatpush3.msra.mxu1 %v512_v24 }
 0x17b   :  { %826 = vmatprep.subr.mxu1 %v986_v0 }
 0x17c   :  { %827 = vmatpush3.msra.mxu1 %v511_v25 }
 0x21d   :  { %v318_v33 = vpop.f32.mrf.mxu1 }
 0x21e   :  { %v319_v34 = vadd.f32 %v318_v33, %v251_v32 }
 0x21f   :  { %v760_v35 = vpop.f32.mrf.mxu1 }
 0x220   :  { %vm322_vm2 = vcmp.ge.f32.partialorder %v319_v34, 0.0  ;;  %v323_v37 = vmul.f32 0.01, %v319_v34 }
 0x222   :  { %v324_v38 = vsel %vm322_vm2, %v319_v34, %v323_v37 }
 0x223   :  { %v328_v39 = vrot.slane %v324_v38, %v1088_v36 }
 0x225   :  { %v329_v40 = vsub.f32 %v324_v38, %v328_v39 }
 0x227   :  { %v330_v41 = vrot.slane %v329_v40, 4  ;;  %v336_v42 = vmul.f32 %v329_v40, %v329_v40 }
 0x229   :  { %v331_v43 = vadd.f32 %v330_v41, %v329_v40  ;;  %v337_v44 = vrot.slane %v336_v42, 4 }
 0x22b   :  { %v332_v45 = vrot.slane %v331_v43, 2  ;;  %v338_v46 = vadd.f32 %v337_v44, %v336_v42 }
 0x22d   :  { %v333_v47 = vadd.f32 %v332_v45, %v331_v43  ;;  %v339_v48 = vrot.slane %v338_v46, 2 }
 0x22f   :  { %v334_v49 = vrot.slane %v333_v47, 1  ;;  %v340_v50 = vadd.f32 %v339_v48, %v338_v46 }
 0x231   :  { %v335_v51 = vadd.f32 %v334_v49, %v333_v47  ;;  %v341_v52 = vrot.slane %v340_v50, 1 }
 0x233   :  { %v342_v53 = vadd.f32 %v341_v52, %v340_v50  ;;  %v343_v54 = vmul.f32 0.125, %v335_v51 }
 0x235   :  { %v344_v55 = vmul.f32 0.125, %v342_v53  ;;  %v345_v56 = vmul.f32 %v343_v54, %v343_v54  ;;  %v348_v62 = vadd.f32 %v343_v54, %v324_v38 }
 0x237   :  { %v346_v57 = vsub.f32 %v344_v55, %v345_v56 }
 0x239   :  { %v347_v58 = vmax.f32 %v346_v57, 0.0 }
 0x23b   :  { %v349_v59 = vadd.f32 1e-05, %v347_v58 }
 0x23d   :  { %845 = vrsqrt.f32 %v349_v59 }
 0x24a   :  { %v846_v60 = vpop.eup %845 }
 0x24b   :  { %v351_v61 = vmul.f32 %v846_v60, %v247_v31 }
 0x24d   :  { %v353_v63 = vrot.slane %v351_v61, 1  ;;  %v363_v3 = vrot.slane %v351_v61, %v1092_v6 }
 0x24f   :  { %v355_v1 = vmul.f32 %v353_v63, %v348_v62  ;;  %v364_v5 = vmul.f32 %v363_v3, %v324_v38 }
 0x251   :  { %v357_v2 = vrot.slane %v355_v1, 6  ;;  %v622_v1 = vld [vmem:[%s1149_s5] ss:$0 sm:$0xff] }
 0x253   :  { %v359_v4 = vsub.f32 %v247_v31, %v357_v2 }
 0x255   :  { %v368_v7 = vrot.slane %v359_v4, %v1095_v10 }
 0x257   :  { %v369_v8 = vadd.f32 %v368_v7, %v364_v5 }
 0x259   :  { %794 = vmatmul.mubr.f32.vlgmr.msra.gmra.mxu0 %v369_v8 }
 0x319   :  { %v459_v28 = vpop.f32.mrf.mxu0 }
 0x31a   :  { %v460_v29 = vadd.f32 %v459_v28, %v392_v27 }
 0x31b   :  { %v795_v30 = vpop.f32.mrf.mxu0 }
 0x31c   :  { %vm463_vm3 = vcmp.ge.f32.partialorder %v460_v29, 0.0  ;;  %v464_v31 = vmul.f32 0.01, %v460_v29 }
 0x31e   :  { %v465_v32 = vsel %vm463_vm3, %v460_v29, %v464_v31 }
 0x31f   :  { %v469_v33 = vrot.slane %v465_v32, %v1088_v36 }
 0x321   :  { %v470_v34 = vsub.f32 %v465_v32, %v469_v33 }
 0x323   :  { %v471_v35 = vrot.slane %v470_v34, 4  ;;  %v477_v37 = vmul.f32 %v470_v34, %v470_v34 }
 0x325   :  { %v472_v38 = vadd.f32 %v471_v35, %v470_v34  ;;  %v478_v39 = vrot.slane %v477_v37, 4 }
 0x327   :  { %v473_v40 = vrot.slane %v472_v38, 2  ;;  %v479_v41 = vadd.f32 %v478_v39, %v477_v37 }
 0x329   :  { %v474_v0 = vadd.f32 %v473_v40, %v472_v38  ;;  %v480_v42 = vrot.slane %v479_v41, 2 }
 0x32b   :  { %v475_v43 = vrot.slane %v474_v0, 1  ;;  %v481_v44 = vadd.f32 %v480_v42, %v479_v41 }
 0x32d   :  { %v476_v45 = vadd.f32 %v475_v43, %v474_v0  ;;  %v482_v46 = vrot.slane %v481_v44, 1 }
 0x32f   :  { %v483_v47 = vadd.f32 %v482_v46, %v481_v44  ;;  %v484_v48 = vmul.f32 0.125, %v476_v45 }
 0x331   :  { %v485_v49 = vmul.f32 0.125, %v483_v47  ;;  %v486_v50 = vmul.f32 %v484_v48, %v484_v48  ;;  %v489_v55 = vadd.f32 %v484_v48, %v465_v32 }
 0x333   :  { %v487_v51 = vsub.f32 %v485_v49, %v486_v50 }
 0x335   :  { %v488_v52 = vmax.f32 %v487_v51, 0.0 }
 0x337   :  { %v490_v36 = vadd.f32 1e-05, %v488_v52 }
 0x339   :  { %847 = vrsqrt.f32 %v490_v36 }
 0x346   :  { %v848_v53 = vpop.eup %847 }
 0x347   :  { %v492_v54 = vmul.f32 %v848_v53, %v388_v26 }
 0x349   :  { %v494_v56 = vrot.slane %v492_v54, 1  ;;  %v504_v59 = vrot.slane %v492_v54, %v1092_v6 }
 0x34b   :  { %v496_v57 = vmul.f32 %v494_v56, %v489_v55  ;;  %v505_v61 = vmul.f32 %v504_v59, %v465_v32 }
 0x34d   :  { %v498_v58 = vrot.slane %v496_v57, 6 }
 0x34f   :  { %v500_v60 = vsub.f32 %v388_v26, %v498_v58 }
 0x351   :  { %v509_v62 = vrot.slane %v500_v60, %v1095_v10 }
 0x353   :  { %v510_v63 = vadd.f32 %v509_v62, %v505_v61 }
 0x355   :  { %829 = vmatmul.mubr.f32.vlgmr.msra.gmra.mxu1 %v510_v63 }
 0x415   :  { %v600_v2 = vpop.f32.mrf.mxu1 }
 0x416   :  { %v601_v3 = vadd.f32 %v622_v1, %v600_v2 }
 0x417   :  { %v830_v4 = vpop.f32.mrf.mxu1 }
 0x418   :  { %604 = vst [vmem:[#allocation11] sm:$0xff] %v601_v3 }
 0x419   :  { %960 = shalt.err (!%p957_p1)
}
 0x41a   :  { %614 = dma.vmem_to_hbm [thread:$0]  %s612_s24, 128, %s1150_s6, [#allocation4]  }
 0x41b   :  { %975 = dma.done.wait [#allocation4], 128  }
 0x41c   :  { %976 = vsyncadd [#allocation4], 4294967168 }
 0x41d   :  { %618 = vsyncpa [#allocation3], 1 }
 0x41e   :  { %619 = vsyncpa [#allocation6], 1 }
 0x41f   :  { %620 = vsyncpa [#allocation9], 1 }
 0x420   :  { %621 = vsyncpa [#allocation4], 1 }

</bundles_post_ra>
